<compile_context>
chip_gen: v7x
topology: tpu7x:2x2x1
jax: 0.10.0
libtpu: 0.0.40
codegen_flags: <defaults>
</compile_context>

<pallas_src>
import functools

import numpy as np
import jax
import jax.numpy as jnp
from jax import lax
from jax.experimental import pallas as pl
from jax.experimental.pallas import tpu as pltpu


# ----------------------------------------------------------------------------
# Kernel: 3x3 "same" conv + bias on a (block_n, Cin, H*W) block, output
# (block_n, Cout, H*W).  One batched MXU matmul per grid step.
# ----------------------------------------------------------------------------
def _conv3x3_kernel(x_ref, w_ref, b_ref, m_ref, o_ref, p_ref, *, H, W):
    # x_ref : (Nb, Cin, H*W)       f32   lane-dense input block (NCHW, spatial flat)
    # w_ref : (Cout, 9*Cin)        bf16  im2col-reshaped conv weight
    # b_ref : (Cout, 1)            f32   bias column
    # m_ref : (9, H*W)             f32   per-tap halo masks (height+width combined)
    # o_ref : (Nb, Cout, H*W)      f32   lane-dense output block
    # p_ref : (9*Cin, Nb*H*W)      bf16  im2col patch matrix scratch
    nb = x_ref.shape[0]
    cin = x_ref.shape[1]
    hw = H * W

    w_mat = w_ref[...]                       # (Cout, 9*Cin) bf16, resident
    masks = m_ref[...]                       # (9, H*W) f32

    taps = [(dh, dw) for dh in (-1, 0, 1) for dw in (-1, 0, 1)]

    # Build the (9*Cin, Nb*H*W) bf16 patch matrix.  Each stencil tap is an XLU
    # lane rotation of the in-register image; the mask zeroes halo wrap-around.
    for n in range(nb):                      # nb <= 4: tiny static unroll
        img = x_ref[n]                       # (Cin, H*W) f32
        for k, (dh, dw) in enumerate(taps):
            off = dh * W + dw                # tap[p] = img[p + off] when in bounds
            if off == 0:
                shifted = img
            else:
                shifted = pltpu.roll(img, shift=(-off) % hw, axis=1)
            tap = shifted * masks[k:k + 1, :]            # zero the border halo
            # Fused mask-multiply + f32->bf16 cast at store time.
            p_ref[pl.ds(k * cin, cin), pl.ds(n * hw, hw)] = tap.astype(p_ref.dtype)

    # ONE MXU matmul per grid step (bf16 operands, f32 accumulation), then a
    # single bias broadcast + add for the whole block.
    acc = jnp.dot(w_mat, p_ref[...], preferred_element_type=jnp.float32)
    out = acc + b_ref[...]                   # (Cout, Nb*H*W)

    for n in range(nb):                      # HW is a multiple of 128 -> lane-aligned
        o_ref[n] = out[:, n * hw:(n + 1) * hw].astype(o_ref.dtype)


# ----------------------------------------------------------------------------
# Public wrapper: PyTorch-style NCHW / OIHW parameters.
# ----------------------------------------------------------------------------
def conv_block_forward(x, weight, bias, *, block_n=None):
    """ConvBlock.forward with use_bn=False: 3x3 stride-1 'same' conv + bias."""
    N, Cin, H, W = x.shape
    Cout = weight.shape[0]
    HW = H * W
    K = 9 * Cin

    if block_n is None:
        # Keep the grid at >= 2 steps so input/output DMA overlaps compute and the
        # "parallel" axis can shard across v7x's two TensorCores; cap the batch
        # block at 4 so the static per-image unroll stays small.
        cap = max(1, min(4, N // 2))
        block_n = 1
        for cand in range(cap, 0, -1):
            if N % cand == 0:
                block_n = cand
                break
    assert N % block_n == 0
    grid = (N // block_n,)

    # One-time host-side parameter re-layout (tiny):
    #   OIHW -> (Cout, kh, kw, Cin) -> (Cout, 9*Cin), bf16 for the MXU.
    w_mat = jnp.transpose(weight, (0, 2, 3, 1)).reshape(Cout, K).astype(jnp.bfloat16)
    b_col = bias.reshape(Cout, 1).astype(jnp.float32)

    # Free row-major reshape: spatial dims flattened onto the lane axis.
    x_flat = x.reshape(N, Cin, HW).astype(jnp.float32)

    # Combined height+width halo mask per stencil tap on the flattened layout:
    # mask[k, p] = 1 iff pixel p's (row+dh, col+dw) neighbour is inside the image.
    rows = np.arange(HW) // W
    cols = np.arange(HW) % W
    mask9 = np.stack([
        ((rows + dh >= 0) & (rows + dh < H) & (cols + dw >= 0) & (cols + dw < W))
        for dh in (-1, 0, 1) for dw in (-1, 0, 1)
    ]).astype(np.float32)
    mask9 = jnp.asarray(mask9)                              # (9, HW)

    # Explicit VMEM budget: double-buffered ins/outs + bf16 patch scratch, with
    # headroom; capped well under v7x's 64 MiB physical VMEM.
    vmem_est = (2 * (block_n * Cin * HW * 4 + block_n * Cout * HW * 4
                     + Cout * K * 2 + Cout * 4 + 9 * HW * 4)
                + K * block_n * HW * 2)
    vmem_limit = int(min(max(4 * vmem_est, 16 << 20), 48 << 20))

    kernel = functools.partial(_conv3x3_kernel, H=H, W=W)
    out_flat = pl.pallas_call(
        kernel,
        out_shape=jax.ShapeDtypeStruct((N, Cout, HW), jnp.float32),
        grid_spec=pltpu.PrefetchScalarGridSpec(
            num_scalar_prefetch=0,
            grid=grid,
            in_specs=[
                pl.BlockSpec((block_n, Cin, HW), lambda b: (b, 0, 0)),
                pl.BlockSpec((Cout, K), lambda b: (0, 0)),
                pl.BlockSpec((Cout, 1), lambda b: (0, 0)),
                pl.BlockSpec((9, HW), lambda b: (0, 0)),
            ],
            out_specs=pl.BlockSpec((block_n, Cout, HW), lambda b: (b, 0, 0)),
            scratch_shapes=[
                pltpu.VMEM((K, block_n * HW), jnp.bfloat16),   # bf16 im2col patches
            ],
        ),
        compiler_params=pltpu.CompilerParams(
            dimension_semantics=("parallel",),
            vmem_limit_bytes=vmem_limit,
        ),
    )(x_flat, w_mat, b_col, mask9)
    return out_flat.reshape(N, Cout, H, W)


# ----------------------------------------------------------------------------
# Pure-JAX reference (module semantics) for the correctness check.
# ----------------------------------------------------------------------------
def ref_conv_block(x, weight, bias):
    y = lax.conv_general_dilated(
        x, weight, window_strides=(1, 1), padding="SAME",
        dimension_numbers=("NCHW", "OIHW", "NCHW"),
        precision=lax.Precision.HIGHEST)
    return y + bias.reshape(1, -1, 1, 1)


if __name__ == "__main__":
    key = jax.random.PRNGKey(0)
    k_x, k_w, k_b = jax.random.split(key, 3)

    N, Cin, H, W = 2, 4, 16, 16
    Cout = 8

    x = jax.random.normal(k_x, (N, Cin, H, W), jnp.float32)        # NCHW, like PyTorch
    bound = 1.0 / float(np.sqrt(9 * Cin))                          # nn.Conv2d-style init
    weight = jax.random.uniform(k_w, (Cout, Cin, 3, 3), jnp.float32, -bound, bound)
    bias = jax.random.uniform(k_b, (Cout,), jnp.float32, -bound, bound)

    out = jax.block_until_ready(conv_block_forward(x, weight, bias))
    assert out.shape == (N, Cout, H, W), out.shape

    # Tight check against the same-semantics reference with bf16-rounded MXU operands.
    ref_bf = jax.block_until_ready(ref_conv_block(
        x.astype(jnp.bfloat16).astype(jnp.float32),
        weight.astype(jnp.bfloat16).astype(jnp.float32), bias))
    # Loose check against the exact f32 module reference (bf16 operand rounding).
    ref_f32 = jax.block_until_ready(ref_conv_block(x, weight, bias))

    err_bf = float(jnp.max(jnp.abs(out - ref_bf)))
    err_f32 = float(jnp.max(jnp.abs(out - ref_f32)))
    assert jnp.allclose(out, ref_bf, rtol=1e-3, atol=1e-3), err_bf
    assert jnp.allclose(out, ref_f32, rtol=5e-2, atol=5e-2), err_f32

    print("KERNEL_OK")
</pallas_src>

<mosaic_0001>
module attributes {stable_mosaic.version = 11 : i64} {
  func.func @_conv3x3_kernel(%arg0: i32, %arg1: memref<1x4x256xf32, #tpu.memory_space<vmem>>, %arg2: memref<8x36xbf16, #tpu.memory_space<vmem>>, %arg3: memref<8x1xf32, #tpu.memory_space<vmem>>, %arg4: memref<9x256xf32, #tpu.memory_space<vmem>>, %arg5: memref<1x8x256xf32, #tpu.memory_space<vmem>>, %arg6: memref<36x256xbf16, #tpu.memory_space<vmem>>) attributes {dimension_semantics = [#tpu.dimension_semantics<parallel>], iteration_bounds = array<i64: 2>, scalar_prefetch = 0 : i64, scratch_operands = 1 : i64, tpu.core_type = #tpu.core_type<tc>, window_params = [{transform_indices = @transform_0, window_bounds = array<i64: 1, 4, 256>}, {pipeline_mode = #tpu.pipeline_mode<synchronous>, transform_indices = @transform_1, window_bounds = array<i64: 8, 36>}, {pipeline_mode = #tpu.pipeline_mode<synchronous>, transform_indices = @transform_2, window_bounds = array<i64: 8, 1>}, {pipeline_mode = #tpu.pipeline_mode<synchronous>, transform_indices = @transform_3, window_bounds = array<i64: 9, 256>}, {transform_indices = @transform_4, window_bounds = array<i64: 1, 8, 256>}]} {
    %c0 = arith.constant 0 : index
    %c0_0 = arith.constant 0 : index
    %0 = vector.load %arg2[%c0, %c0_0] : memref<8x36xbf16, #tpu.memory_space<vmem>>, vector<8x36xbf16>
    %c0_1 = arith.constant 0 : index
    %c0_2 = arith.constant 0 : index
    %1 = vector.load %arg4[%c0_1, %c0_2] : memref<9x256xf32, #tpu.memory_space<vmem>>, vector<9x256xf32>
    %c0_3 = arith.constant 0 : index
    %c0_4 = arith.constant 0 : index
    %c0_5 = arith.constant 0 : index
    %2 = vector.load %arg1[%c0_3, %c0_4, %c0_5] : memref<1x4x256xf32, #tpu.memory_space<vmem>>, vector<1x4x256xf32>
    %3 = vector.shape_cast %2 : vector<1x4x256xf32> to vector<4x256xf32>
    %c17_i32 = arith.constant 17 : i32
    %4 = tpu.dynamic_rotate %3 by %c17_i32 dim 1 : vector<4x256xf32>, i32 -> vector<4x256xf32>
    %5 = vector.extract_strided_slice %1 {offsets = [0, 0], sizes = [1, 256], strides = [1, 1]} : vector<9x256xf32> to vector<1x256xf32>
    %6 = vector.broadcast %5 : vector<1x256xf32> to vector<4x256xf32>
    %7 = arith.mulf %4, %6 : vector<4x256xf32>
    %8 = arith.truncf %7 : vector<4x256xf32> to vector<4x256xbf16>
    %c0_6 = arith.constant 0 : index
    %c0_7 = arith.constant 0 : index
    %9 = vector.load %arg6[%c0_6, %c0_7] : memref<36x256xbf16, #tpu.memory_space<vmem>>, vector<4x256xbf16>
    tpu.vector_store %arg6[%c0_6, %c0_7], %8 {strides = array<i32>} : memref<36x256xbf16, #tpu.memory_space<vmem>>, vector<4x256xbf16>,
    %c16_i32 = arith.constant 16 : i32
    %10 = tpu.dynamic_rotate %3 by %c16_i32 dim 1 : vector<4x256xf32>, i32 -> vector<4x256xf32>
    %11 = vector.extract_strided_slice %1 {offsets = [1, 0], sizes = [1, 256], strides = [1, 1]} : vector<9x256xf32> to vector<1x256xf32>
    %12 = vector.broadcast %11 : vector<1x256xf32> to vector<4x256xf32>
    %13 = arith.mulf %10, %12 : vector<4x256xf32>
    %14 = arith.truncf %13 : vector<4x256xf32> to vector<4x256xbf16>
    %c4 = arith.constant 4 : index
    %c0_8 = arith.constant 0 : index
    %15 = vector.load %arg6[%c4, %c0_8] : memref<36x256xbf16, #tpu.memory_space<vmem>>, vector<4x256xbf16>
    tpu.vector_store %arg6[%c4, %c0_8], %14 {strides = array<i32>} : memref<36x256xbf16, #tpu.memory_space<vmem>>, vector<4x256xbf16>,
    %c15_i32 = arith.constant 15 : i32
    %16 = tpu.dynamic_rotate %3 by %c15_i32 dim 1 : vector<4x256xf32>, i32 -> vector<4x256xf32>
    %17 = vector.extract_strided_slice %1 {offsets = [2, 0], sizes = [1, 256], strides = [1, 1]} : vector<9x256xf32> to vector<1x256xf32>
    %18 = vector.broadcast %17 : vector<1x256xf32> to vector<4x256xf32>
    %19 = arith.mulf %16, %18 : vector<4x256xf32>
    %20 = arith.truncf %19 : vector<4x256xf32> to vector<4x256xbf16>
    %c8 = arith.constant 8 : index
    %c0_9 = arith.constant 0 : index
    %21 = vector.load %arg6[%c8, %c0_9] : memref<36x256xbf16, #tpu.memory_space<vmem>>, vector<4x256xbf16>
    tpu.vector_store %arg6[%c8, %c0_9], %20 {strides = array<i32>} : memref<36x256xbf16, #tpu.memory_space<vmem>>, vector<4x256xbf16>,
    %c1_i32 = arith.constant 1 : i32
    %22 = tpu.dynamic_rotate %3 by %c1_i32 dim 1 : vector<4x256xf32>, i32 -> vector<4x256xf32>
    %23 = vector.extract_strided_slice %1 {offsets = [3, 0], sizes = [1, 256], strides = [1, 1]} : vector<9x256xf32> to vector<1x256xf32>
    %24 = vector.broadcast %23 : vector<1x256xf32> to vector<4x256xf32>
    %25 = arith.mulf %22, %24 : vector<4x256xf32>
    %26 = arith.truncf %25 : vector<4x256xf32> to vector<4x256xbf16>
    %c12 = arith.constant 12 : index
    %c0_10 = arith.constant 0 : index
    %27 = vector.load %arg6[%c12, %c0_10] : memref<36x256xbf16, #tpu.memory_space<vmem>>, vector<4x256xbf16>
    tpu.vector_store %arg6[%c12, %c0_10], %26 {strides = array<i32>} : memref<36x256xbf16, #tpu.memory_space<vmem>>, vector<4x256xbf16>,
    %28 = vector.extract_strided_slice %1 {offsets = [4, 0], sizes = [1, 256], strides = [1, 1]} : vector<9x256xf32> to vector<1x256xf32>
    %29 = vector.broadcast %28 : vector<1x256xf32> to vector<4x256xf32>
    %30 = arith.mulf %3, %29 : vector<4x256xf32>
    %31 = arith.truncf %30 : vector<4x256xf32> to vector<4x256xbf16>
    %c16 = arith.constant 16 : index
    %c0_11 = arith.constant 0 : index
    %32 = vector.load %arg6[%c16, %c0_11] : memref<36x256xbf16, #tpu.memory_space<vmem>>, vector<4x256xbf16>
    tpu.vector_store %arg6[%c16, %c0_11], %31 {strides = array<i32>} : memref<36x256xbf16, #tpu.memory_space<vmem>>, vector<4x256xbf16>,
    %c255_i32 = arith.constant 255 : i32
    %33 = tpu.dynamic_rotate %3 by %c255_i32 dim 1 : vector<4x256xf32>, i32 -> vector<4x256xf32>
    %34 = vector.extract_strided_slice %1 {offsets = [5, 0], sizes = [1, 256], strides = [1, 1]} : vector<9x256xf32> to vector<1x256xf32>
    %35 = vector.broadcast %34 : vector<1x256xf32> to vector<4x256xf32>
    %36 = arith.mulf %33, %35 : vector<4x256xf32>
    %37 = arith.truncf %36 : vector<4x256xf32> to vector<4x256xbf16>
    %c20 = arith.constant 20 : index
    %c0_12 = arith.constant 0 : index
    %38 = vector.load %arg6[%c20, %c0_12] : memref<36x256xbf16, #tpu.memory_space<vmem>>, vector<4x256xbf16>
    tpu.vector_store %arg6[%c20, %c0_12], %37 {strides = array<i32>} : memref<36x256xbf16, #tpu.memory_space<vmem>>, vector<4x256xbf16>,
    %c241_i32 = arith.constant 241 : i32
    %39 = tpu.dynamic_rotate %3 by %c241_i32 dim 1 : vector<4x256xf32>, i32 -> vector<4x256xf32>
    %40 = vector.extract_strided_slice %1 {offsets = [6, 0], sizes = [1, 256], strides = [1, 1]} : vector<9x256xf32> to vector<1x256xf32>
    %41 = vector.broadcast %40 : vector<1x256xf32> to vector<4x256xf32>
    %42 = arith.mulf %39, %41 : vector<4x256xf32>
    %43 = arith.truncf %42 : vector<4x256xf32> to vector<4x256xbf16>
    %c24 = arith.constant 24 : index
    %c0_13 = arith.constant 0 : index
    %44 = vector.load %arg6[%c24, %c0_13] : memref<36x256xbf16, #tpu.memory_space<vmem>>, vector<4x256xbf16>
    tpu.vector_store %arg6[%c24, %c0_13], %43 {strides = array<i32>} : memref<36x256xbf16, #tpu.memory_space<vmem>>, vector<4x256xbf16>,
    %c240_i32 = arith.constant 240 : i32
    %45 = tpu.dynamic_rotate %3 by %c240_i32 dim 1 : vector<4x256xf32>, i32 -> vector<4x256xf32>
    %46 = vector.extract_strided_slice %1 {offsets = [7, 0], sizes = [1, 256], strides = [1, 1]} : vector<9x256xf32> to vector<1x256xf32>
    %47 = vector.broadcast %46 : vector<1x256xf32> to vector<4x256xf32>
    %48 = arith.mulf %45, %47 : vector<4x256xf32>
    %49 = arith.truncf %48 : vector<4x256xf32> to vector<4x256xbf16>
    %c28 = arith.constant 28 : index
    %c0_14 = arith.constant 0 : index
    %50 = vector.load %arg6[%c28, %c0_14] : memref<36x256xbf16, #tpu.memory_space<vmem>>, vector<4x256xbf16>
    tpu.vector_store %arg6[%c28, %c0_14], %49 {strides = array<i32>} : memref<36x256xbf16, #tpu.memory_space<vmem>>, vector<4x256xbf16>,
    %c239_i32 = arith.constant 239 : i32
    %51 = tpu.dynamic_rotate %3 by %c239_i32 dim 1 : vector<4x256xf32>, i32 -> vector<4x256xf32>
    %52 = vector.extract_strided_slice %1 {offsets = [8, 0], sizes = [1, 256], strides = [1, 1]} : vector<9x256xf32> to vector<1x256xf32>
    %53 = vector.broadcast %52 : vector<1x256xf32> to vector<4x256xf32>
    %54 = arith.mulf %51, %53 : vector<4x256xf32>
    %55 = arith.truncf %54 : vector<4x256xf32> to vector<4x256xbf16>
    %c32 = arith.constant 32 : index
    %c0_15 = arith.constant 0 : index
    %56 = vector.load %arg6[%c32, %c0_15] : memref<36x256xbf16, #tpu.memory_space<vmem>>, vector<4x256xbf16>
    tpu.vector_store %arg6[%c32, %c0_15], %55 {strides = array<i32>} : memref<36x256xbf16, #tpu.memory_space<vmem>>, vector<4x256xbf16>,
    %c0_16 = arith.constant 0 : index
    %c0_17 = arith.constant 0 : index
    %57 = vector.load %arg6[%c0_16, %c0_17] : memref<36x256xbf16, #tpu.memory_space<vmem>>, vector<36x256xbf16>
    %cst = arith.constant dense<0.000000e+00> : vector<8x256xf32>
    %58 = tpu.matmul %0, %57, %cst {dimension_numbers = #tpu.dot_dimension_numbers<[1], [0], [0], [1], [0, 0, 1, 1], [], []>} : vector<8x36xbf16>, vector<36x256xbf16>, vector<8x256xf32> -> vector<8x256xf32>
    %c0_18 = arith.constant 0 : index
    %c0_19 = arith.constant 0 : index
    %59 = vector.load %arg3[%c0_18, %c0_19] : memref<8x1xf32, #tpu.memory_space<vmem>>, vector<8x1xf32>
    %60 = vector.broadcast %59 : vector<8x1xf32> to vector<8x256xf32>
    %61 = arith.addf %58, %60 : vector<8x256xf32>
    %c0_20 = arith.constant 0 : index
    %c0_21 = arith.constant 0 : index
    %c0_22 = arith.constant 0 : index
    %62 = vector.load %arg5[%c0_20, %c0_21, %c0_22] : memref<1x8x256xf32, #tpu.memory_space<vmem>>, vector<1x8x256xf32>
    %63 = vector.shape_cast %62 : vector<1x8x256xf32> to vector<8x256xf32>
    %64 = vector.shape_cast %61 : vector<8x256xf32> to vector<1x8x256xf32>
    tpu.vector_store %arg5[%c0_20, %c0_21, %c0_22], %64 {strides = array<i32>} : memref<1x8x256xf32, #tpu.memory_space<vmem>>, vector<1x8x256xf32>,
    return
  }
  func.func @transform_0(%arg0: i32) -> (i32, i32, i32) {
    %c0_i32 = arith.constant 0 : i32
    %c0_i32_0 = arith.constant 0 : i32
    %c0_i32_1 = arith.constant 0 : i32
    return %arg0, %c0_i32, %c0_i32_0 : i32, i32, i32
  }
  func.func @transform_1(%arg0: i32) -> (i32, i32) {
    %c0_i32 = arith.constant 0 : i32
    %c0_i32_0 = arith.constant 0 : i32
    %c0_i32_1 = arith.constant 0 : i32
    return %c0_i32, %c0_i32_0 : i32, i32
  }
  func.func @transform_2(%arg0: i32) -> (i32, i32) {
    %c0_i32 = arith.constant 0 : i32
    %c0_i32_0 = arith.constant 0 : i32
    %c0_i32_1 = arith.constant 0 : i32
    return %c0_i32, %c0_i32_0 : i32, i32
  }
  func.func @transform_3(%arg0: i32) -> (i32, i32) {
    %c0_i32 = arith.constant 0 : i32
    %c0_i32_0 = arith.constant 0 : i32
    %c0_i32_1 = arith.constant 0 : i32
    return %c0_i32, %c0_i32_0 : i32, i32
  }
  func.func @transform_4(%arg0: i32) -> (i32, i32, i32) {
    %c0_i32 = arith.constant 0 : i32
    %c0_i32_0 = arith.constant 0 : i32
    %c0_i32_1 = arith.constant 0 : i32
    return %arg0, %c0_i32, %c0_i32_0 : i32, i32, i32
  }
}

</mosaic_0001>

<bundles_post_ra>
// kernel: tpu_custom_call.1
= control target key start
LH: loop header
LB: loop body
LE: loop exit
PB: predicated region body
PF: predicated region fallthrough
CT: control target
= control target key end

     0   :  { %9 = vsyncpa [#allocation4], 0  ;;  %s1211_s0 = inlined_call_operand.hbm [shape: f32[2,4,256], index: 0, kind: input, shape index: {}]   ;;  %s1212_s1 = inlined_call_operand.vmem [shape: bf16[8,36], index: 1, kind: input, shape index: {}]   ;;  %s1213_s2 = inlined_call_operand.vmem [shape: f32[8,1], index: 2, kind: input, shape index: {}]   ;;  %s1214_s3 = inlined_call_operand.hbm [shape: f32[9,256], index: 3, kind: input, shape index: {}]   ;;  %s1215_s4 = inlined_call_operand.hbm [shape: f32[2,8,256], index: 4, kind: output, shape index: {}]  }
   0x1   :  { %11 = vsyncpa [#allocation4 + $0x1], 0 }
   0x2   :  { %12 = vsyncpa [#allocation7], 0 }
   0x3   :  { %13 = vsyncpa [#allocation5], 0 }
   0x4   :  { %15 = vsyncpa [#allocation5 + $0x1], 0  ;;  %s956_s15 = smov 0   ;;  %s958_s16 = smov 0  }
   0x5   :  { %s960_s17 = smov 0   ;;  %s962_s18 = smov 0  }
   0x6 LB: > { %s977_s19 = sadd.s32 4294967295, %s915_s18   ;;  %s663_s20 = sadd.s32 4294967294, %s915_s18   ;;  %s915_s18 = sphi %s962_s18, %s1235_s18   ;;  %s911_s17 = sphi %s960_s17, %s1234_s17   ;;  %s907_s16 = sphi %s958_s16, %s1233_s16   ;;  %s903_s15 = sphi %s956_s15, %s1232_s15  }
   0x7   : > { %p41_p0 = scmp.ne.s32.totalorder %s907_s16, %s903_s15  ;;  %p1216_p1 = scmp.eq.s32.totalorder %s977_s19, 0 }
   0x8   : > { %p134_p3 = scmp.eq.s32.totalorder %s663_s20, 1  ;;  %p664_p5 = scmp.ge.s32.totalorder %s915_s18, 1 }
   0x9   : > { %p986_p4 = por %p1216_p1, %p41_p0  ;;  %p141_p7 = scmp.lt.s32.totalorder %s915_s18, 3 }
   0xa   : > { %p991_p6 = por %p134_p3, %p41_p0  ;;  %s917_s24 = smov [#allocation6]  }
   0xb   : > { %s1219_s21 = scalar_select %p986_p4, 1, 0 }
   0xc   : > { %s1220_s22 = scalar_select %p991_p6, 1, 0 }
   0xd   : > { %p996_p8 = pnand %p664_p5, %p141_p7  ;;  %s159_s25 = sshll.u32 %s917_s24, 4  ;;  %s1000_s25 = int_to_ptr.vmem [resolvable:$true] %s159_s25 }
   0xe   : > { %s1012_s27 = sadd.s32 1, %s915_s18   ;;  %s28_s28 = sadd.s32 1, %s911_s17 }
   0xf   : > { %s1221_s23 = scalar_select %p996_p8, 1, 0 }
  0x10   : > { %p717_p9 = pneg %p996_p8  ;;  %s25_s29 = ssub.s32 %s915_s18, %s1012_s27 }
  0x11   : > { %s787_s6 = scalar_lea.hbm %s1214_s3, 512 }
  0x12   : > { %p1007_p11 = pnand %p717_p9, %p1216_p1  ;;  %p788_p12 = scmp.ne.s32.totalorder %s1214_s3, %s787_s6 }
  0x13   : > { %p794_p5 = scmp.lt.u32.totalorder %s787_s6, %s1214_s3 }
  0x14   : > { %p789_p13 = pneg %p1007_p11 }
  0x16   : > { %p790_p0 = pnand %p789_p13, %p788_p12 }
  0x18   : > { %p791_p3 = pneg %p790_p0 }
  0x1a   : > { %p796_p7 = pnand %p794_p5, %p791_p3 }
  0x1c   : > { %799 = shalt.err (!%p796_p7)
}
  0x1d   : > { %s800_s11 = scalar_lea.vmem %s1000_s25, 512  ;;  %p808_p2 = scmp.lt.s32.totalorder %s1000_s25, %s1000_s25 }
  0x1e   : > { %p801_p9 = scmp.ne.s32.totalorder %s1000_s25, %s800_s11  ;;  %p809_p6 = scmp.lt.s32.totalorder %s800_s11, %s800_s11 }
  0x20   : > { %p803_p10 = pnand %p801_p9, %p789_p13  ;;  %p810_p4 = por %p809_p6, %p808_p2 }
  0x22   : > { %p804_p1 = pneg %p803_p10 }
  0x24   : > { %p811_p8 = pnand %p810_p4, %p804_p1 }
  0x26   : > { %814 = shalt.err (!%p811_p8)
}
  0x27   : > { %s918_s12 = smov 256   ;;  %s919_s13 = smov 16  }
  0x28   : > { %720 = dma.hbm_to_vmem [thread:$0]  (!%p1007_p11), %s1214_s3, 512, %s1000_s25, [#allocation7], %s918_s12, %s918_s12, %s919_s13  }
  0x29   : > { %p26_p2 = scmp.eq.s32.totalorder %s25_s29, 0  ;;  %p35_p1 = scmp.ne.s32.totalorder %s911_s17, %s907_s16 }
  0x2a   : > { %p36_p4 = scmp.eq.s32.totalorder %s915_s18, 0  ;;  %p730_p6 = scmp.lt.s32.totalorder %s915_s18, 2 }
  0x2b   : > { %s1043_s24 = scalar_select %p26_p2, %s911_s17, %s28_s28  }
  0x2c   : > { %p37_p8 = por %p36_p4, %p35_p1  ;;  %p1223_p10 = scmp.eq.s32.totalorder %s977_s19, 1 }
  0x2d   : > { %s173_s5 = sand.u32 1, %s911_s17   ;;  %s698_s6 = sshll.u32 %s915_s18, 7 }
  0x2e   : > { %p1047_p12 = por %p1223_p10, %p35_p1  ;;  %s667_s7 = sshll.u32 %s173_s5, 3 }
  0x2f   : > { %s1056_s9 = scalar_lea.hbm %s1211_s0, %s698_s6  ;;  %s177_s25 = scalar_lea.vmem [#allocation3], %s667_s7 }
  0x30   : > { %s185_s28 = sshll.u32 %s177_s25, 4  ;;  %p1058_p11 = pnand %p730_p6, %p37_p8  ;;  %s1062_s28 = int_to_ptr.vmem [resolvable:$true] %s185_s28 }
  0x31   : > { %s174_s10 = scalar_lea.sflag [#allocation4], %s173_s5  ;;  %s815_s11 = scalar_lea.hbm %s1056_s9, 128 }
  0x32   : > { %p816_p13 = scmp.ne.s32.totalorder %s1056_s9, %s815_s11  ;;  %p817_p0 = pneg %p1058_p11 }
  0x33   : > { %s820_s14 = scalar_lea.hbm %s1211_s0, 256  ;;  %p821_p7 = scmp.lt.u32.totalorder %s1056_s9, %s1211_s0 }
  0x34   : > { %p818_p3 = pnand %p817_p0, %p816_p13  ;;  %p822_p9 = scmp.lt.u32.totalorder %s820_s14, %s815_s11 }
  0x35   : > { %p824_p1 = scmp.lt.u32.totalorder %s815_s11, %s1056_s9 }
  0x36   : > { %p819_p5 = pneg %p818_p3  ;;  %p823_p2 = por %p822_p9, %p821_p7 }
  0x38   : > { %p825_p4 = por %p824_p1, %p823_p2 }
  0x3a   : > { %p826_p6 = pnand %p825_p4, %p819_p5 }
  0x3c   : > { %829 = shalt.err (!%p826_p6)
}
  0x3d   : > { %s830_s5 = scalar_lea.vmem %s1062_s28, 128  ;;  %s920_s7 = smov [#allocation3]  }
  0x3e   : > { %p831_p8 = scmp.ne.s32.totalorder %s1062_s28, %s830_s5  ;;  %s835_s26 = sshll.u32 %s920_s7, 4  ;;  %s836_s26 = int_to_ptr.vmem [resolvable:$false] %s835_s26 }
  0x3f   : > { %s837_s8 = scalar_lea.vmem %s836_s26, 256  ;;  %p838_p3 = scmp.lt.s32.totalorder %s1062_s28, %s836_s26 }
  0x40   : > { %p833_p10 = pnand %p831_p8, %p817_p0  ;;  %p839_p7 = scmp.lt.s32.totalorder %s837_s8, %s830_s5 }
  0x42   : > { %p834_p13 = pneg %p833_p10  ;;  %p840_p9 = por %p839_p7, %p838_p3 }
  0x44   : > { %p841_p2 = pnand %p840_p9, %p834_p13 }
  0x46   : > { %844 = shalt.err (!%p841_p2)
}
  0x47   : > { %724 = dma.hbm_to_vmem [thread:$0]  (!%p1058_p11), %s1056_s9, 128, %s1062_s28, %s174_s10  }
  0x48   : > { %p1226_p5 = scmp.ne.s32.totalorder %s1221_s23, 0 }
  0x49   : > { %s1092_s25 = sand.u32 (!%p1226_p5), 1, %s907_s16   ;;  %p1227_p0 = scmp.ne.s32.totalorder (!%p1226_p5), %s1219_s21, 0 }
  0x4a   : > { %194 = sbr.rel (%p1226_p5) target bundleno = 477 (0x1dd), region = 36  ;;  %s671_s11 = sshll.u32 (!%p1226_p5), %s1092_s25, 3 }
  0x4b   : > { %s197_s12 = scalar_lea.sflag (!%p1226_p5), [#allocation4], %s1092_s25  ;;  %s200_s13 = scalar_lea.vmem (!%p1226_p5), [#allocation3], %s671_s11 }
  0x51   : > { %890 = dma.done.wait (%p1227_p0), %s197_s12, 128  }
  0x52   : > { %892 = vsyncadd (%p1227_p0), %s197_s12, 4294967168  ;;  %p1228_p1 = scmp.eq.s32.totalorder %s977_s19, 0 }
  0x54   : > { %894 = dma.done.wait (%p1228_p1), [#allocation7], 512   ;;  %p1229_p11 = pmov %p1228_p1 }
  0x55   : > { %v243_v0 = vlaneseq  ;;  %v235_v7 = vld [vmem:[%s200_s13] sm:$0xff]  ;;  %v231_v8 = vld [vmem:[#allocation6] sm:$0xff]  ;;  %v232_v9 = vld [vmem:[#allocation6 + $0x8] sm:$0xff]  ;;  %s921_s23 = smov 1   ;;  %s922_s21 = smov 16   ;;  %v929_v34 = vmov 0  }
  0x56   : > { %896 = vsyncadd (%p1229_p11), [#allocation7], 4294966784  ;;  %320 = vrot.lane.b32.xlu1 %v235_v7, %s921_s23  ;;  %267 = vrot.lane.b32.xlu0 %v235_v7, %s922_s21  ;;  %v237_v10 = vcombine.high %v235_v7, %v235_v7  ;;  %s923_s9 = smov 17   ;;  %s924_s28 = smov 15   ;;  %v483_v35 = vld [vmem:[%s1213_s2] sm:$0xff]  ;;  %vm518_vm8 = vcmask 1041408  }
  0x57   : > { %v249_v1 = vshrl.u32 %v243_v0, 7  ;;  %s925_s29 = smov 127   ;;  %s926_s10 = smov 112   ;;  %557 = vmatprep.mubr.bf16.mxu0 %v929_v34  ;;  %777 = vset.pattern.permute.xlu0 %v929_v34  ;;  %v1133_v36 = vand.u32 127, %v243_v0  ;;  %vm514_vm9 = vcmask 293888  }
  0x58   : > { %s927_s14 = smov 113   ;;  %s928_s20 = smov 111  }
  0x59   : > { %v329_v2 = vsub.s32 3, %v249_v1  ;;  %v349_v3 = vsub.s32 4, %v249_v1  ;;  %v250_v4 = vsub.s32 0, %v249_v1  ;;  %v276_v5 = vsub.s32 1, %v249_v1  ;;  %s673_s8 = sshll.u32 %s1092_s25, 4  ;;  %s708_s11 = sshll.u32 %s977_s19, 8 }
  0x5a   : > { %v303_v6 = vsub.s32 2, %v249_v1  ;;  %v381_v22 = vsub.s32 5, %v249_v1  ;;  %239 = vrot.lane.b32.xlu0 %v235_v7, %s923_s9  ;;  %322 = vrot.lane.b32.xlu1 %v237_v10, %s921_s23  ;;  %v434_v26 = vsub.s32 7, %v249_v1  ;;  %v408_v30 = vsub.s32 6, %v249_v1  ;;  %s228_s12 = scalar_lea.vmem [#allocation8], %s673_s8  ;;  %s569_s19 = scalar_lea.sflag [#allocation5], %s1092_s25 }
  0x5b   : > { %v330_v11 = vrot.slane %v231_v8, %v329_v2  ;;  %v334_v12 = vrot.slane %v232_v9, %v329_v2  ;;  %v350_v13 = vrot.slane %v231_v8, %v349_v3  ;;  %v354_v14 = vrot.slane %v232_v9, %v349_v3  ;;  %s583_s13 = sshll.u32 %s228_s12, 4  ;;  %s1169_s13 = int_to_ptr.vmem [resolvable:$true] %s583_s13 }
  0x5c   : > { %v1105_v15 = vrot.slane %v231_v8, %v250_v4  ;;  %v1107_v16 = vrot.slane %v232_v9, %v250_v4  ;;  %v1109_v17 = vrot.slane %v231_v8, %v276_v5  ;;  %v1111_v18 = vrot.slane %v232_v9, %v276_v5 }
  0x5d   : > { %v1113_v19 = vrot.slane %v231_v8, %v303_v6  ;;  %v1115_v20 = vrot.slane %v232_v9, %v303_v6  ;;  %v357_v21 = vcombine.low %v350_v13, %v354_v14  ;;  %v1117_v24 = vrot.slane %v231_v8, %v381_v22 }
  0x5e   : > { %v1119_v25 = vrot.slane %v232_v9, %v381_v22  ;;  %v1121_v27 = vrot.slane %v231_v8, %v434_v26  ;;  %v1123_v28 = vrot.slane %v232_v9, %v434_v26  ;;  %241 = vrot.lane.b32.xlu1 %v237_v10, %s923_s9  ;;  %269 = vrot.lane.b32.xlu0 %v237_v10, %s922_s21  ;;  %vm324_vm0 = vcmp.lt.s32.totalorder %v1133_v36, 1  ;;  %s1167_s9 = scalar_lea.hbm %s1215_s4, %s708_s11 }
  0x5f   : > { %v359_v23 = vmul.f32 %v357_v21, %v235_v7  ;;  %v1125_v32 = vrot.slane %v231_v8, %v408_v30  ;;  %v1127_v33 = vrot.slane %v232_v9, %v408_v30  ;;  %vm245_vm1 = vcmp.lt.s32.totalorder %v1133_v36, 17 }
  0x60   : > { %vm271_vm2 = vcmp.lt.s32.totalorder %v1133_v36, 16  ;;  %vm298_vm3 = vcmp.lt.s32.totalorder %v1133_v36, 15  ;;  %vm376_vm4 = vcmp.lt.s32.totalorder %v1133_v36, 127  ;;  %vm429_vm5 = vcmp.lt.s32.totalorder %v1133_v36, 112 }
  0x61   : > { %v361_v29 = vcombine.high %v359_v23, %v359_v23  ;;  %vm403_vm6 = vcmp.lt.s32.totalorder %v1133_v36, 113  ;;  %vm456_vm7 = vcmp.lt.s32.totalorder %v1133_v36, 111 }
  0x62   : > { %296 = vrot.lane.b32.xlu1 %v237_v10, %s924_s28  ;;  %294 = vrot.lane.b32.xlu0 %v235_v7, %s924_s28  ;;  %s845_s28 = scalar_lea.vmem %s1169_s13, 256 }
  0x63   : > { %v703_v31 = vpack.c.bf16 %v361_v29, %v359_v23  ;;  %v683_v29 = vld [vmem:[#allocation6 + $0x18] ss:$0 sm:$0xff]  ;;  %p846_p4 = scmp.ne.s32.totalorder %s1169_s13, %s845_s28 }
  0x65   : > { %371 = vst [vmem:[#allocation2 + $0x10] sm:$0x33] %v703_v31  ;;  %p847_p6 = pnand %p846_p4, %p1047_p12 }
  0x66   : > { %374 = vrot.lane.b32.xlu1 %v237_v10, %s925_s29  ;;  %372 = vrot.lane.b32.xlu0 %v235_v7, %s925_s29  ;;  %s930_s29 = smov [#allocation8]  }
  0x67   : > { %p848_p8 = pneg %p847_p6 }
  0x6a   : > { %427 = vrot.lane.b32.xlu1 %v237_v10, %s926_s10  ;;  %425 = vrot.lane.b32.xlu0 %v235_v7, %s926_s10  ;;  %s849_s10 = sshll.u32 %s930_s29, 4  ;;  %s850_s10 = int_to_ptr.vmem [resolvable:$false] %s849_s10 }
  0x6b   : > { %p852_p10 = scmp.lt.s32.totalorder %s1169_s13, %s850_s10 }
  0x6e   : > { %401 = vrot.lane.b32.xlu1 %v237_v10, %s927_s14  ;;  %399 = vrot.lane.b32.xlu0 %v235_v7, %s927_s14  ;;  %s851_s14 = scalar_lea.vmem %s850_s10, 512 }
  0x6f   : > { %p853_p13 = scmp.lt.s32.totalorder %s851_s14, %s845_s28 }
  0x71   : > { %p854_p3 = por %p853_p13, %p852_p10 }
  0x72   : > { %454 = vrot.lane.b32.xlu1 %v237_v10, %s928_s20  ;;  %452 = vrot.lane.b32.xlu0 %v235_v7, %s928_s20 }
  0x73   : > { %p855_p7 = pnand %p854_p3, %p848_p8 }
  0x76   : > { %486 = vperm.xlu0 %777, %v483_v35  }
  0xc8   : > { %v321_v37 = vpop.permute.xlu1 %320  ;;  %v268_v38 = vpop.permute.xlu0 %267 }
  0xcc   : > { %v240_v39 = vpop.permute.xlu0 %239  ;;  %v323_v40 = vpop.permute.xlu1 %322 }
  0xcd   : > { %v325_v41 = vsel %vm324_vm0, %v321_v37, %v323_v40  ;;  %v326_v42 = vsel %vm324_vm0, %v323_v40, %v321_v37 }
  0xce   : > { %v335_v43 = vmul.f32 %v330_v11, %v326_v42  ;;  %v336_v44 = vmul.f32 %v334_v12, %v325_v41 }
  0xd0   : > { %v702_v45 = vpack.c.bf16 %v336_v44, %v335_v43  ;;  %v242_v46 = vpop.permute.xlu1 %241  ;;  %v270_v47 = vpop.permute.xlu0 %269  ;;  %v230_v43 = vld [vmem:[%s1212_s1] sm:$0xf] }
  0xd1   : > { %v246_v48 = vsel %vm245_vm1, %v240_v39, %v242_v46  ;;  %v247_v49 = vsel %vm245_vm1, %v242_v46, %v240_v39  ;;  %v272_v50 = vsel %vm271_vm2, %v268_v38, %v270_v47  ;;  %v273_v51 = vsel %vm271_vm2, %v270_v47, %v268_v38 }
  0xd2   : > { %v344_v52 = vrot.slane %v702_v45, 6  ;;  %v256_v53 = vmul.f32 %v1105_v15, %v247_v49  ;;  %v257_v54 = vmul.f32 %v1107_v16, %v246_v48  ;;  %v282_v55 = vmul.f32 %v1109_v17, %v273_v51 }
  0xd3   : > { %v283_v56 = vmul.f32 %v1111_v18, %v272_v50 }
  0xd4   : > { %346 = vst [vmem:[#allocation2 + $0x8] sm:$0xcc] %v344_v52  ;;  %v699_v57 = vpack.c.bf16 %v257_v54, %v256_v53  ;;  %v297_v58 = vpop.permute.xlu1 %296  ;;  %v295_v59 = vpop.permute.xlu0 %294 }
  0xd5   : > { %v700_v60 = vpack.c.bf16 %v283_v56, %v282_v55  ;;  %v299_v61 = vsel %vm298_vm3, %v295_v59, %v297_v58  ;;  %v300_v62 = vsel %vm298_vm3, %v297_v58, %v295_v59 }
  0xd6   : > { %266 = vst [vmem:[#allocation2] sm:$0x33] %v699_v57  ;;  %v309_v63 = vmul.f32 %v1113_v19, %v300_v62  ;;  %v310_v0 = vmul.f32 %v1115_v20, %v299_v61 }
  0xd7   : > { %v291_v1 = vrot.slane %v700_v60, 6 }
  0xd8   : > { %v701_v2 = vpack.c.bf16 %v310_v0, %v309_v63  ;;  %v375_v3 = vpop.permute.xlu1 %374  ;;  %v373_v4 = vpop.permute.xlu0 %372 }
  0xd9   : > { %293 = vst [vmem:[#allocation2] sm:$0xcc] %v291_v1  ;;  %v377_v5 = vsel %vm376_vm4, %v373_v4, %v375_v3  ;;  %v378_v6 = vsel %vm376_vm4, %v375_v3, %v373_v4 }
  0xda   : > { %319 = vst [vmem:[#allocation2 + $0x8] sm:$0x33] %v701_v2  ;;  %v387_v7 = vmul.f32 %v1117_v24, %v377_v5  ;;  %v388_v8 = vmul.f32 %v1119_v25, %v378_v6 }
  0xdc   : > { %v704_v9 = vpack.c.bf16 %v388_v8, %v387_v7  ;;  %v428_v10 = vpop.permute.xlu1 %427  ;;  %v426_v11 = vpop.permute.xlu0 %425 }
  0xdd   : > { %v430_v12 = vsel %vm429_vm5, %v426_v11, %v428_v10  ;;  %v431_v13 = vsel %vm429_vm5, %v428_v10, %v426_v11 }
  0xde   : > { %v396_v14 = vrot.slane %v704_v9, 6  ;;  %v440_v15 = vmul.f32 %v1121_v27, %v430_v12  ;;  %v441_v16 = vmul.f32 %v1123_v28, %v431_v13  ;;  %v682_v27 = vld [vmem:[#allocation6 + $0x10] ss:$0 sm:$0xff] }
  0xe0   : > { %398 = vst [vmem:[#allocation2 + $0x10] sm:$0xcc] %v396_v14  ;;  %v706_v17 = vpack.c.bf16 %v441_v16, %v440_v15  ;;  %v402_v18 = vpop.permute.xlu1 %401  ;;  %v400_v19 = vpop.permute.xlu0 %399 }
  0xe1   : > { %v404_v20 = vsel %vm403_vm6, %v400_v19, %v402_v18  ;;  %v405_v21 = vsel %vm403_vm6, %v402_v18, %v400_v19  ;;  %v779_v22 = vld [vmem:[#allocation2 + $0x4] ss:$8 sps:$4 sm:$0xff]   ;;  %v781_v23 = vld [vmem:[#allocation2] ss:$8 sps:$4 sm:$0xff]  }
  0xe2   : > { %v449_v24 = vrot.slane %v706_v17, 6  ;;  %v414_v25 = vmul.f32 %v1125_v32, %v404_v20  ;;  %v415_v26 = vmul.f32 %v1127_v33, %v405_v21  ;;  %525 = vmatprep.subr.bf16.mxu0 %v779_v22 }
  0xe3   : > { %526 = vmatpush1.bf16.msra.mxu0 %v781_v23 }
  0xe4   : > { %451 = vst [vmem:[#allocation2 + $0x18] sm:$0xcc] %v449_v24  ;;  %v705_v28 = vpack.c.bf16 %v415_v26, %v414_v25  ;;  %v455_v30 = vpop.permute.xlu1 %454  ;;  %v453_v31 = vpop.permute.xlu0 %452 }
  0xe5   : > { %v457_v34 = vsel %vm456_vm7, %v453_v31, %v455_v30  ;;  %v458_v35 = vsel %vm456_vm7, %v455_v30, %v453_v31 }
  0xe6   : > { %424 = vst [vmem:[#allocation2 + $0x18] sm:$0x33] %v705_v28  ;;  %v467_v37 = vmul.f32 %v682_v27, %v457_v34  ;;  %v468_v38 = vmul.f32 %v683_v29, %v458_v35 }
  0xe8   : > { %v707_v39 = vpack.c.bf16 %v468_v38, %v467_v37 }
  0xea   : > { %477 = vst [vmem:[#allocation2 + $0x20] sm:$0x33] %v707_v39 }
  0xed   : > { %v782_v32 = vld [vmem:[#allocation2 + $0x14] ss:$8 sps:$4 sm:$0xff]   ;;  %v784_v33 = vld [vmem:[#allocation2 + $0x10] ss:$8 sps:$4 sm:$0xff]  }
  0xee   : > { %527 = vmatprep.subr.bf16.mxu0 %v782_v32 }
  0xef   : > { %528 = vmatpush1.bf16.msra.mxu0 %v784_v33 }
  0xf1   : > { %v482_v36 = vld [vmem:[#allocation2 + $0x20] sm:$0x33] }
  0xf2   : > { %v690_v40 = vcombine.high %v482_v36, %v482_v36  ;;  %v689_v41 = vcombine.low %v482_v36, %v482_v36 }
  0xf4   : > { %691 = vmatprep.subr.msk.bf16.mxu0 %vm518_vm8, %v690_v40  ;;  %v520_v42 = vsel %vm518_vm8, %v689_v41, 0 }
  0xf5   : > { %530 = vmatpush1.bf16.msra.mxu0 %v520_v42  ;;  %v487_v44 = vpop.permute.xlu0 %486 }
  0xf8   : > { %692 = vmatmul.mubr.msk.bf16.vlgmr.msra.gmra.mrb[0].mxu0 %vm514_vm9, %v230_v43 }
 0x1cb   : > { %v559_v45 = vpop.f32.mrb[0].mxu0 }
 0x1cc   : > { %v560_v46 = vadd.f32 %v559_v45, %v487_v44  ;;  %v561_v47 = vpop.f32.mrb[1].mxu0 }
 0x1cd   : > { %v562_v48 = vadd.f32 %v561_v47, %v487_v44  ;;  %v563_v49 = vpop.f32.mrb[2].mxu0 }
 0x1ce   : > { %566 = vst [vmem:[%s228_s12] sm:$0xff] %v560_v46  ;;  %v564_v50 = vpop.f32.mrb[3].mxu0 }
 0x1cf   : > { %567 = vst [vmem:[%s228_s12 + $0x8] sm:$0xff] %v562_v48 }
 0x1d0   : > { %858 = shalt.err (!%p855_p7)
}
 0x1d1   : > { %s859_s25 = scalar_lea.hbm %s1167_s9, 256  ;;  %s863_s5 = scalar_lea.hbm %s1215_s4, 512 }
 0x1d2   : > { %p860_p9 = scmp.ne.s32.totalorder %s1167_s9, %s859_s25  ;;  %p864_p0 = scmp.lt.u32.totalorder %s1167_s9, %s1215_s4 }
 0x1d3   : > { %p865_p1 = scmp.lt.u32.totalorder %s863_s5, %s859_s25  ;;  %p867_p4 = scmp.lt.u32.totalorder %s859_s25, %s1167_s9 }
 0x1d4   : > { %p861_p2 = pnand %p860_p9, %p1047_p12 }
 0x1d5   : > { %p866_p11 = por %p865_p1, %p864_p0 }
 0x1d6   : > { %p862_p5 = pneg %p861_p2 }
 0x1d7   : > { %p868_p6 = por %p867_p4, %p866_p11 }
 0x1d9   : > { %p869_p8 = pnand %p868_p6, %p862_p5 }
 0x1db   : > { %872 = shalt.err (!%p869_p8)
}
 0x1dc   : > { %715 = dma.vmem_to_hbm [thread:$0]  (%p1047_p12), %s1169_s13, 256, %s1167_s9, %s569_s19  }
 0x1dd PF: > { %s595_s8 = sand.u32 1, %s903_s15   ;;  %p1230_p10 = scmp.ne.s32.totalorder %s1220_s22, 0 }
 0x1de   : > { %p1231_p13 = scmp.ge.s32.totalorder %s915_s18, 2  ;;  %s596_s11 = scalar_lea.sflag [#allocation5], %s595_s8 }
 0x1e0   : > { %p726_p3 = pnand %p1231_p13, %p1230_p10 }
 0x1e2   : > { %898 = dma.done.wait (!%p726_p3), %s596_s11, 256  }
 0x1e3   : > { %900 = vsyncadd (!%p726_p3), %s596_s11, 4294967040  ;;  %p18_p7 = scmp.ge.s32.totalorder %s1012_s27, 4   ;;  %s1232_s15 = smov %s907_s16 }
 0x1e4   : > { %s1233_s16 = smov %s911_s17  ;;  %s1234_s17 = smov %s1043_s24 }
 0x1e5   : > { %s1235_s18 = smov %s1012_s27  ;;  %20 = sbr.rel (!%p18_p7) target bundleno = 6 (0x6), region = 85 }
 0x1ec   :  { %601 = vsyncpa [#allocation4], 1 }
 0x1ed   :  { %603 = vsyncpa [#allocation4 + $0x1], 1 }
 0x1ee   :  { %604 = vsyncpa [#allocation7], 1 }
 0x1ef   :  { %605 = vsyncpa [#allocation5], 1 }
 0x1f0   :  { %607 = vsyncpa [#allocation5 + $0x1], 1 }

</bundles_post_ra>
